<compile_context>
chip_gen: v5e
topology: v5e:2x2
jax: 0.10.0
libtpu: 0.0.40
codegen_flags: <defaults>
</compile_context>

<pallas_src>
import jax
import jax.numpy as jnp
from jax.experimental import pallas as pl
from jax.experimental.pallas import tpu as pltpu


def _round_up(x, m):
    return ((x + m - 1) // m) * m


def _linear_kernel(x_ref, w_ref, b_ref, o_ref, acc_ref):
    """Computes one (tm, tn) output tile; K is reduced over grid axis 2."""
    k = pl.program_id(2)

    @pl.when(k == 0)
    def _():
        acc_ref[...] = jnp.zeros_like(acc_ref)

    acc_ref[...] += jnp.dot(
        x_ref[...], w_ref[...], preferred_element_type=jnp.float32
    )

    @pl.when(k == pl.num_programs(2) - 1)
    def _():
        # Bias add in f32, single downcast at the very end.
        o_ref[...] = (acc_ref[...] + b_ref[...].astype(jnp.float32)).astype(
            o_ref.dtype
        )


def pallas_linear(x_flat, weight_kn, bias_n, *, tm=512, tn=256, tk=512,
                  compute_dtype=None):
    """y = x_flat @ weight_kn + bias_n via a tiled Pallas TPU matmul.

    x_flat: [M, K], weight_kn: [K, N] (pre-transposed), bias_n: [N] -> [M, N].
    compute_dtype: optionally cast x/W (e.g. to bfloat16) for the MXU;
    accumulation is always float32.
    """
    M, K = x_flat.shape
    Kw, N = weight_kn.shape
    assert K == Kw, "weight must be pre-transposed to [in_features, out_features]"

    out_dtype = x_flat.dtype
    if compute_dtype is not None:
        x_flat = x_flat.astype(compute_dtype)
        weight_kn = weight_kn.astype(compute_dtype)

    # Clip tiles to the (lane/sublane-aligned) padded problem size.
    tm = min(tm, _round_up(M, 8))      # sublane-aligned M tile
    tn = min(tn, _round_up(N, 128))    # lane-dense N tile
    tk = min(tk, _round_up(K, 128))    # lane-aligned contraction tile

    Mp = _round_up(M, tm)
    Np = _round_up(N, tn)
    Kp = _round_up(K, tk)

    # Zero-pad once in HBM; zeros are exact for matmul + bias.
    if (Mp, Kp) != (M, K):
        x_flat = jnp.pad(x_flat, ((0, Mp - M), (0, Kp - K)))
    if (Kp, Np) != (K, N):
        weight_kn = jnp.pad(weight_kn, ((0, Kp - K), (0, Np - N)))
    bias_2d = bias_n.reshape(1, N)
    if Np != N:
        bias_2d = jnp.pad(bias_2d, ((0, 0), (0, Np - N)))

    grid = (Mp // tm, Np // tn, Kp // tk)

    in_itemsize = jnp.dtype(x_flat.dtype).itemsize
    out_itemsize = jnp.dtype(out_dtype).itemsize

    # VMEM budget: double-buffered x/w/bias tiles + double-buffered output
    # tile + f32 accumulator, with headroom; capped well under v7x's 64 MiB.
    vmem_need = (2 * (tm * tk + tk * tn + tn) * in_itemsize
                 + 2 * tm * tn * out_itemsize
                 + tm * tn * 4)
    vmem_limit = int(min(max(3 * vmem_need, 16 * 1024 * 1024),
                         48 * 1024 * 1024))

    bytes_accessed = (Mp * Kp * in_itemsize        # x
                      + Kp * Np * in_itemsize      # weight
                      + Np * in_itemsize           # bias
                      + Mp * Np * out_itemsize)    # output

    y = pl.pallas_call(
        _linear_kernel,
        out_shape=jax.ShapeDtypeStruct((Mp, Np), out_dtype),
        grid_spec=pltpu.PrefetchScalarGridSpec(
            num_scalar_prefetch=0,
            grid=grid,
            in_specs=[
                pl.BlockSpec((tm, tk), lambda i, j, k: (i, k)),
                pl.BlockSpec((tk, tn), lambda i, j, k: (k, j)),
                pl.BlockSpec((1, tn), lambda i, j, k: (0, j)),
            ],
            out_specs=pl.BlockSpec((tm, tn), lambda i, j, k: (i, j)),
            scratch_shapes=[pltpu.VMEM((tm, tn), jnp.float32)],
        ),
        compiler_params=pltpu.CompilerParams(
            dimension_semantics=("parallel", "parallel", "arbitrary"),
            vmem_limit_bytes=vmem_limit,
        ),
        cost_estimate=pl.CostEstimate(
            flops=2 * Mp * Np * Kp,
            transcendentals=0,
            bytes_accessed=bytes_accessed,
        ),
    )(x_flat, weight_kn, bias_2d)

    if (Mp, Np) != (M, N):
        y = y[:M, :N]
    return y


def time_distributed_linear(x, weight_kn, bias_n, *, batch_first=True,
                            compute_dtype=None):
    """JAX/Pallas equivalent of TimeDistributed(nn.Linear)(x).

    x: rank-2 tensor -> linear applied directly;
       rank>=3       -> leading dims flattened, linear applied, reshaped back
                        exactly as TimeDistributed.forward does.
    """
    if x.ndim <= 2:
        return pallas_linear(x, weight_kn, bias_n, compute_dtype=compute_dtype)

    if batch_first:
        # (B, T, ..., K) -> (B*T*..., K)
        x_reshape = x.reshape((-1,) + x.shape[2:])
    else:
        x_reshape = x.reshape((-1,) + x.shape[1:])

    y = pallas_linear(x_reshape, weight_kn, bias_n, compute_dtype=compute_dtype)

    if batch_first:
        # y.view(x.size(0), -1, y.size(-1))
        return y.reshape(x.shape[0], -1, y.shape[-1])
    else:
        # y.view(-1, x.size(1), y.size(-1))
        return y.reshape(-1, x.shape[1], y.shape[-1])


if __name__ == "__main__":
    key = jax.random.PRNGKey(0)

    # ---- Test 1: small shapes implied by the module (batch, seq, hidden) ----
    B, T, K, N = 2, 8, 32, 32
    kx, kw, kb, kx2, kw2, kb2 = jax.random.split(key, 6)

    x = jax.random.normal(kx, (B, T, K), dtype=jnp.float32)

    # PyTorch-style Linear init: uniform(-1/sqrt(K), 1/sqrt(K)), weight (out, in)
    bound = 1.0 / (K ** 0.5)
    weight_nk = jax.random.uniform(kw, (N, K), minval=-bound, maxval=bound,
                                   dtype=jnp.float32)
    bias_n = jax.random.uniform(kb, (N,), minval=-bound, maxval=bound,
                                dtype=jnp.float32)
    weight_kn = weight_nk.T  # kernel layout [K, N]

    y = time_distributed_linear(x, weight_kn, bias_n, batch_first=True)
    y = jax.block_until_ready(y)

    y_ref = (x.reshape(-1, K) @ weight_kn + bias_n).reshape(B, -1, N)
    assert y.shape == (B, T, N)
    assert jnp.allclose(y, y_ref, atol=1e-5, rtol=1e-5)

    # ---- Test 2: exercise padding + multi-step K reduction axis ----
    B2, T2, K2, N2 = 3, 7, 700, 130
    x2 = jax.random.normal(kx2, (B2, T2, K2), dtype=jnp.float32)
    bound2 = 1.0 / (K2 ** 0.5)
    w2_kn = jax.random.uniform(kw2, (K2, N2), minval=-bound2, maxval=bound2,
                               dtype=jnp.float32)
    b2 = jax.random.uniform(kb2, (N2,), minval=-bound2, maxval=bound2,
                            dtype=jnp.float32)

    y2 = time_distributed_linear(x2, w2_kn, b2, batch_first=True)
    y2 = jax.block_until_ready(y2)

    y2_ref = (x2.reshape(-1, K2) @ w2_kn + b2).reshape(B2, -1, N2)
    assert y2.shape == (B2, T2, N2)
    assert jnp.allclose(y2, y2_ref, atol=1e-3, rtol=1e-3)

    print("KERNEL_OK")
</pallas_src>

<mosaic_0001>
module attributes {stable_mosaic.version = 11 : i64} {
  func.func @_linear_kernel(%arg0: i32, %arg1: i32, %arg2: i32, %arg3: memref<16x128xf32, #tpu.memory_space<vmem>>, %arg4: memref<128x128xf32, #tpu.memory_space<vmem>>, %arg5: memref<1x128xf32, #tpu.memory_space<vmem>>, %arg6: memref<16x128xf32, #tpu.memory_space<vmem>>, %arg7: memref<16x128xf32, #tpu.memory_space<vmem>>) attributes {dimension_semantics = [#tpu.dimension_semantics<parallel>, #tpu.dimension_semantics<parallel>, #tpu.dimension_semantics<arbitrary>], iteration_bounds = array<i64: 1, 1, 1>, scalar_prefetch = 0 : i64, scratch_operands = 1 : i64, tpu.core_type = #tpu.core_type<tc>, window_params = [{transform_indices = @transform_0, window_bounds = array<i64: 16, 128>}, {transform_indices = @transform_1, window_bounds = array<i64: 128, 128>}, {transform_indices = @transform_2, window_bounds = array<i64: 1, 128>}, {transform_indices = @transform_3, window_bounds = array<i64: 16, 128>}]} {
    %c0_i32 = arith.constant 0 : i32
    %0 = arith.cmpi eq, %arg2, %c0_i32 : i32
    %1 = arith.extui %0 : i1 to i32
    %c0_i32_0 = arith.constant 0 : i32
    %2 = arith.cmpi ne, %1, %c0_i32_0 : i32
    scf.if %2 {
      %cst_10 = arith.constant 0.000000e+00 : f32
      %12 = vector.broadcast %cst_10 : f32 to vector<16x128xf32>
      %c0_11 = arith.constant 0 : index
      %c0_12 = arith.constant 0 : index
      %13 = vector.load %arg7[%c0_11, %c0_12] : memref<16x128xf32, #tpu.memory_space<vmem>>, vector<16x128xf32>
      tpu.vector_store %arg7[%c0_11, %c0_12], %12 {strides = array<i32>} : memref<16x128xf32, #tpu.memory_space<vmem>>, vector<16x128xf32>,
    } else {
    }
    %c0 = arith.constant 0 : index
    %c0_1 = arith.constant 0 : index
    %3 = vector.load %arg7[%c0, %c0_1] : memref<16x128xf32, #tpu.memory_space<vmem>>, vector<16x128xf32>
    %c0_2 = arith.constant 0 : index
    %c0_3 = arith.constant 0 : index
    %4 = vector.load %arg3[%c0_2, %c0_3] : memref<16x128xf32, #tpu.memory_space<vmem>>, vector<16x128xf32>
    %c0_4 = arith.constant 0 : index
    %c0_5 = arith.constant 0 : index
    %5 = vector.load %arg4[%c0_4, %c0_5] : memref<128x128xf32, #tpu.memory_space<vmem>>, vector<128x128xf32>
    %cst = arith.constant dense<0.000000e+00> : vector<16x128xf32>
    %6 = tpu.matmul %4, %5, %cst {dimension_numbers = #tpu.dot_dimension_numbers<[1], [0], [0], [1], [0, 0, 1, 1], [], []>} : vector<16x128xf32>, vector<128x128xf32>, vector<16x128xf32> -> vector<16x128xf32>
    %7 = arith.addf %3, %6 : vector<16x128xf32>
    %c0_6 = arith.constant 0 : index
    %c0_7 = arith.constant 0 : index
    %8 = vector.load %arg7[%c0_6, %c0_7] : memref<16x128xf32, #tpu.memory_space<vmem>>, vector<16x128xf32>
    tpu.vector_store %arg7[%c0_6, %c0_7], %7 {strides = array<i32>} : memref<16x128xf32, #tpu.memory_space<vmem>>, vector<16x128xf32>,
    %c0_i32_8 = arith.constant 0 : i32
    %9 = arith.cmpi eq, %arg2, %c0_i32_8 : i32
    %10 = arith.extui %9 : i1 to i32
    %c0_i32_9 = arith.constant 0 : i32
    %11 = arith.cmpi ne, %10, %c0_i32_9 : i32
    scf.if %11 {
      %c0_10 = arith.constant 0 : index
      %c0_11 = arith.constant 0 : index
      %12 = vector.load %arg7[%c0_10, %c0_11] : memref<16x128xf32, #tpu.memory_space<vmem>>, vector<16x128xf32>
      %c0_12 = arith.constant 0 : index
      %c0_13 = arith.constant 0 : index
      %13 = vector.load %arg5[%c0_12, %c0_13] : memref<1x128xf32, #tpu.memory_space<vmem>>, vector<1x128xf32>
      %14 = vector.broadcast %13 : vector<1x128xf32> to vector<16x128xf32>
      %15 = arith.addf %12, %14 : vector<16x128xf32>
      %c0_14 = arith.constant 0 : index
      %c0_15 = arith.constant 0 : index
      %16 = vector.load %arg6[%c0_14, %c0_15] : memref<16x128xf32, #tpu.memory_space<vmem>>, vector<16x128xf32>
      tpu.vector_store %arg6[%c0_14, %c0_15], %15 {strides = array<i32>} : memref<16x128xf32, #tpu.memory_space<vmem>>, vector<16x128xf32>,
    } else {
    }
    return
  }
  func.func @transform_0(%arg0: i32, %arg1: i32, %arg2: i32) -> (i32, i32) {
    %c0_i32 = arith.constant 0 : i32
    return %arg0, %arg2 : i32, i32
  }
  func.func @transform_1(%arg0: i32, %arg1: i32, %arg2: i32) -> (i32, i32) {
    %c0_i32 = arith.constant 0 : i32
    return %arg2, %arg1 : i32, i32
  }
  func.func @transform_2(%arg0: i32, %arg1: i32, %arg2: i32) -> (i32, i32) {
    %c0_i32 = arith.constant 0 : i32
    %c0_i32_0 = arith.constant 0 : i32
    return %c0_i32, %arg1 : i32, i32
  }
  func.func @transform_3(%arg0: i32, %arg1: i32, %arg2: i32) -> (i32, i32) {
    %c0_i32 = arith.constant 0 : i32
    return %arg0, %arg1 : i32, i32
  }
}

</mosaic_0001>

<bundles_post_ra>
// kernel: tpu_custom_call.1
= control target key start
LH: loop header
LB: loop body
LE: loop exit
PB: predicated region body
PF: predicated region fallthrough
CT: control target
= control target key end

     0   :  { %8 = vsyncpa [#allocation4], 0  ;;  %s279_s0 = inlined_call_operand.hbm [shape: f32[16,128], index: 0, kind: input, shape index: {}]   ;;  %s280_s1 = inlined_call_operand.hbm [shape: f32[128,128], index: 1, kind: input, shape index: {}]   ;;  %s281_s2 = inlined_call_operand.vmem [shape: f32[1,128], index: 2, kind: input, shape index: {}]   ;;  %s282_s3 = inlined_call_operand.hbm [shape: f32[16,128], index: 3, kind: output, shape index: {}]  }
   0x1   :  { %9 = vsyncpa [#allocation7], 0 }
   0x2   :  { %10 = vsyncpa [#allocation5], 0  ;;  %s15_s14 = sshll.u32 %s279_s0, 4  ;;  %s233_s15 = smov [#allocation3]   ;;  %s16_s14 = int_to_ptr.hbm [resolvable:$true] %s15_s14 }
   0x3   :  { %s17_s16 = sshll.u32 %s233_s15, 4  ;;  %s28_s19 = sshll.u32 %s280_s1, 4  ;;  %s18_s16 = int_to_ptr.vmem [resolvable:$true] %s17_s16  ;;  %s29_s19 = int_to_ptr.hbm [resolvable:$true] %s28_s19 }
   0x4   :  { %s234_s20 = smov 128   ;;  %s235_s21 = smov 8  }
   0x5   :  { %23 = dma.hbm_to_vmem [thread:$0]  %s16_s14, 256, %s18_s16, [#allocation4], %s234_s20, %s234_s20, %s235_s21  }
   0x6   :  { %s236_s22 = smov [#allocation6]  }
   0x7   :  { %s30_s23 = sshll.u32 %s236_s22, 4  ;;  %s31_s23 = int_to_ptr.vmem [resolvable:$true] %s30_s23 }
   0x8   :  { %36 = dma.hbm_to_vmem [thread:$0]  %s29_s19, 2048, %s31_s23, [#allocation7], %s234_s20, %s234_s20, %s235_s21  }
   0x9   :  { %227 = dma.done.wait [#allocation4], 256  }
   0xa   :  { %228 = vsyncadd [#allocation4], 4294967040 }
   0xb   :  { %229 = dma.done.wait [#allocation7], 2048  }
   0xc   :  { %230 = vsyncadd [#allocation7], 4294965248  ;;  %v72_v0 = vld [vmem:[#allocation6 + $0x78] sm:$0xff]  ;;  %v71_v1 = vld [vmem:[#allocation6 + $0x70] sm:$0xff]  ;;  %s237_s24 = smov [#allocation8]   ;;  %s119_s28 = sshll.u32 %s282_s3, 4  ;;  %s120_s28 = int_to_ptr.hbm [resolvable:$true] %s119_s28 }
   0xd   :  { %73 = vmatpush.msra.mxu0 %v72_v0  ;;  %133 = vmatpush.msra.mxu1 %v72_v0  ;;  %v70_v2 = vld [vmem:[#allocation6 + $0x68] sm:$0xff]  ;;  %v69_v3 = vld [vmem:[#allocation6 + $0x60] sm:$0xff]  ;;  %v68_v4 = vld [vmem:[#allocation6 + $0x58] sm:$0xff]  ;;  %s117_s25 = sshll.u32 %s237_s24, 4  ;;  %s118_s25 = int_to_ptr.vmem [resolvable:$true] %s117_s25 }
   0xe   :  { %v67_v5 = vld [vmem:[#allocation6 + $0x50] sm:$0xff]  ;;  %v66_v6 = vld [vmem:[#allocation6 + $0x48] sm:$0xff]  ;;  %v65_v7 = vld [vmem:[#allocation6 + $0x40] sm:$0xff] }
   0xf   :  { %74 = vmatpush.msra.mxu0 %v71_v1  ;;  %134 = vmatpush.msra.mxu1 %v71_v1  ;;  %v64_v8 = vld [vmem:[#allocation6 + $0x38] sm:$0xff]  ;;  %v63_v9 = vld [vmem:[#allocation6 + $0x30] sm:$0xff]  ;;  %v62_v10 = vld [vmem:[#allocation6 + $0x28] sm:$0xff] }
  0x10   :  { %v61_v11 = vld [vmem:[#allocation6 + $0x20] sm:$0xff]  ;;  %v60_v12 = vld [vmem:[#allocation6 + $0x18] sm:$0xff]  ;;  %v59_v13 = vld [vmem:[#allocation6 + $0x10] sm:$0xff] }
  0x11   :  { %75 = vmatpush.msra.mxu0 %v70_v2  ;;  %135 = vmatpush.msra.mxu1 %v70_v2  ;;  %v58_v14 = vld [vmem:[#allocation6 + $0x8] sm:$0xff]  ;;  %v57_v15 = vld [vmem:[#allocation6] sm:$0xff]  ;;  %v55_v16 = vld [vmem:[#allocation3] sm:$0xff] }
  0x12   :  { %v56_v17 = vld [vmem:[#allocation3 + $0x8] sm:$0xff]  ;;  %v154_v18 = vld [vmem:[%s281_s2] ss:$0 sm:$0xff] }
  0x13   :  { %76 = vmatpush.msra.mxu0 %v69_v3  ;;  %136 = vmatpush.msra.mxu1 %v69_v3 }
  0x15   :  { %77 = vmatpush.msra.mxu0 %v68_v4  ;;  %137 = vmatpush.msra.mxu1 %v68_v4 }
  0x17   :  { %78 = vmatpush.msra.mxu0 %v67_v5  ;;  %138 = vmatpush.msra.mxu1 %v67_v5 }
  0x19   :  { %79 = vmatpush.msra.mxu0 %v66_v6  ;;  %139 = vmatpush.msra.mxu1 %v66_v6 }
  0x1b   :  { %80 = vmatpush.msra.mxu0 %v65_v7  ;;  %140 = vmatpush.msra.mxu1 %v65_v7 }
  0x1d   :  { %81 = vmatpush.msra.mxu0 %v64_v8  ;;  %141 = vmatpush.msra.mxu1 %v64_v8 }
  0x1f   :  { %82 = vmatpush.msra.mxu0 %v63_v9  ;;  %142 = vmatpush.msra.mxu1 %v63_v9 }
  0x21   :  { %83 = vmatpush.msra.mxu0 %v62_v10  ;;  %143 = vmatpush.msra.mxu1 %v62_v10 }
  0x23   :  { %84 = vmatpush.msra.mxu0 %v61_v11  ;;  %144 = vmatpush.msra.mxu1 %v61_v11 }
  0x25   :  { %85 = vmatpush.msra.mxu0 %v60_v12  ;;  %145 = vmatpush.msra.mxu1 %v60_v12 }
  0x27   :  { %86 = vmatpush.msra.mxu0 %v59_v13  ;;  %146 = vmatpush.msra.mxu1 %v59_v13 }
  0x29   :  { %87 = vmatpush.msra.mxu0 %v58_v14  ;;  %147 = vmatpush.msra.mxu1 %v58_v14 }
  0x2b   :  { %88 = vmatpush.msra.mxu0 %v57_v15  ;;  %148 = vmatpush.msra.mxu1 %v57_v15 }
  0x2c   :  { %89 = vmatmul.f32.vlgmr.msra.gmra.mxu0 %v55_v16  ;;  %92 = vmatmul.f32.vlgmr.msra.gmra.mxu1 %v56_v17 }
  0xa9   :  { %v90_v19 = vpop.f32.mrf.mxu0  ;;  %v93_v20 = vpop.f32.mrf.mxu1 }
  0xaa   :  { %v109_v21 = vadd.f32 %v154_v18, %v90_v19  ;;  %v110_v22 = vadd.f32 %v154_v18, %v93_v20 }
  0xac   :  { %111 = vst [vmem:[#allocation8] sm:$0xff] %v109_v21 }
  0xad   :  { %112 = vst [vmem:[#allocation8 + $0x8] sm:$0xff] %v110_v22 }
  0xae   :  { %125 = dma.vmem_to_hbm [thread:$0]  %s118_s25, 256, %s120_s28, [#allocation5], %s234_s20, %s234_s20, %s235_s21  }
  0xaf   :  { %231 = dma.done.wait [#allocation5], 256  }
  0xb0   :  { %232 = vsyncadd [#allocation5], 4294967040 }
  0xb1   :  { %130 = vsyncpa [#allocation4], 1 }
  0xb2   :  { %131 = vsyncpa [#allocation7], 1 }
  0xb3   :  { %132 = vsyncpa [#allocation5], 1 }

</bundles_post_ra>
